<compile_context>
chip_gen: v7x
topology: tpu7x:2x2x1
jax: 0.10.0
libtpu: 0.0.40
codegen_flags: <defaults>
</compile_context>

<pallas_src>
import math
import jax
import jax.numpy as jnp
import numpy as np
from jax.experimental import pallas as pl
from jax.experimental.pallas import tpu as pltpu

OUT_HW = 32  # hard-coded F.interpolate target size in the reference module


def _round_up(v, m):
    return (v + m - 1) // m * m


# ----------------------------------------------------------------------------
# Stand-in "backbone": 3x3 strided conv + ReLU as a tiled, accumulated matmul
# ----------------------------------------------------------------------------
def _matmul_bias_relu_kernel(a_ref, w_ref, b_ref, o_ref, acc_ref):
    k = pl.program_id(2)

    @pl.when(k == 0)
    def _():
        acc_ref[...] = jnp.zeros_like(acc_ref)

    acc_ref[...] += jnp.dot(a_ref[...], w_ref[...],
                            preferred_element_type=jnp.float32)

    @pl.when(k == pl.num_programs(2) - 1)
    def _():
        o_ref[...] = jnp.maximum(acc_ref[...] + b_ref[...], 0.0)


def _conv_patches(x_nhwc, stride):
    """(N,H,W,C) -> im2col patch matrix (N*Ho*Wo, 9*C), taps channels-last."""
    N, H, W, C = x_nhwc.shape
    xp = jnp.pad(x_nhwc, ((0, 0), (1, 1), (1, 1), (0, 0)))
    Ho = (H + 2 - 3) // stride + 1
    Wo = (W + 2 - 3) // stride + 1
    cols = []
    for kh in range(3):
        for kw in range(3):
            sl = jax.lax.slice(
                xp, (0, kh, kw, 0),
                (N, kh + (Ho - 1) * stride + 1, kw + (Wo - 1) * stride + 1, C),
                (1, stride, stride, 1))                       # (N, Ho, Wo, C)
            cols.append(sl)
    a = jnp.concatenate(cols, axis=-1).reshape(N * Ho * Wo, 9 * C)
    return a, Ho, Wo


def conv3x3_relu(x_nhwc, w, b, stride):
    """3x3 conv (padding=1, bias) + ReLU. bf16 MXU operands, f32 accumulate."""
    N = x_nhwc.shape[0]
    a, Ho, Wo = _conv_patches(x_nhwc, stride)
    M, K = a.shape
    Cout = w.shape[1]

    tk = min(512, _round_up(K, 128))       # lane-dense contraction tiles
    Kp = _round_up(K, tk)
    tn = 128 if Cout <= 128 else 256       # >=256 fills v6e/v7x MXU columns
    Cp = _round_up(Cout, tn)
    tm = min(512, _round_up(M, 8))
    Mp = _round_up(M, tm)

    ap = jnp.pad(a, ((0, Mp - M), (0, Kp - K))).astype(jnp.bfloat16)
    wp = jnp.pad(w, ((0, Kp - K), (0, Cp - Cout))).astype(jnp.bfloat16)
    bp = jnp.pad(b, ((0, 0), (0, Cp - Cout)))                 # f32 bias

    y = pl.pallas_call(
        _matmul_bias_relu_kernel,
        out_shape=jax.ShapeDtypeStruct((Mp, Cp), jnp.float32),
        grid=(Mp // tm, Cp // tn, Kp // tk),
        in_specs=[pl.BlockSpec((tm, tk), lambda i, j, k: (i, k)),
                  pl.BlockSpec((tk, tn), lambda i, j, k: (k, j)),
                  pl.BlockSpec((1, tn), lambda i, j, k: (0, j))],
        out_specs=pl.BlockSpec((tm, tn), lambda i, j, k: (i, j)),
        scratch_shapes=[pltpu.VMEM((tm, tn), jnp.float32)],
        compiler_params=pltpu.CompilerParams(
            dimension_semantics=("parallel", "parallel", "arbitrary")),
    )(ap, wp, bp)
    return y[:M, :Cout].reshape(N, Ho, Wo, Cout)              # NHWC


# ----------------------------------------------------------------------------
# Tail: fused (bilinear resize + 3x3 avg-pool) matmul per scale with channels
# on lanes; shared sum-of-squares, rsqrt L2-normalize, weighted spatial mean.
# ----------------------------------------------------------------------------
def _tail_kernel(f2_ref, m2_ref, f3_ref, m3_ref, o_ref):
    # f*: (B, HWp, C) bf16 ; m*: (1024, HWp) bf16 ; o: (B, 1, CPAD) f32
    inv_area = 1.0 / float(OUT_HW * OUT_HW)
    B = f2_ref.shape[0]
    cpad = o_ref.shape[2]
    rows = []
    for bi in range(B):                               # static unroll, B small
        p2 = jnp.dot(m2_ref[...], f2_ref[bi],
                     preferred_element_type=jnp.float32)        # (1024, C2)
        p3 = jnp.dot(m3_ref[...], f3_ref[bi],
                     preferred_element_type=jnp.float32)        # (1024, C3)
        # per-pixel sum of squares over all channels (no feature concat)
        ssq = (jnp.sum(p2 * p2, axis=1, keepdims=True)
               + jnp.sum(p3 * p3, axis=1, keepdims=True))       # (1024, 1)
        # F.normalize clamp_min(1e-12) folded into rsqrt; 1/1024 mean folded in
        wgt = jax.lax.rsqrt(jnp.maximum(ssq, 1e-24)) * inv_area  # (1024, 1)
        out2 = jnp.sum(p2 * wgt, axis=0, keepdims=True)          # (1, C2)
        out3 = jnp.sum(p3 * wgt, axis=0, keepdims=True)          # (1, C3)
        pad = cpad - (out2.shape[1] + out3.shape[1])
        pieces = [out2, out3]
        if pad > 0:
            pieces.append(jnp.zeros((1, pad), jnp.float32))
        rows.append(jnp.concatenate(pieces, axis=1).reshape(1, 1, cpad))
    o_ref[...] = jnp.concatenate(rows, axis=0)                   # (B,1,CPAD)


def _bilinear_matrix_np(out_size, in_size):
    """Matrix reproducing F.interpolate bilinear, align_corners=False."""
    i = np.arange(out_size, dtype=np.float64)
    scale = in_size / out_size
    src = np.maximum((i + 0.5) * scale - 0.5, 0.0)
    i0 = np.floor(src).astype(np.int64)
    lam = src - i0
    i0 = np.clip(i0, 0, in_size - 1)
    i1 = np.minimum(i0 + 1, in_size - 1)
    A = np.zeros((out_size, in_size), np.float64)
    A[np.arange(out_size), i0] += 1.0 - lam
    A[np.arange(out_size), i1] += lam
    return A


def _box_band_np(n):
    idx = np.arange(n)
    return (np.abs(idx[:, None] - idx[None, :]) <= 1).astype(np.float64)


def _fused_resize_pool_matrix(H, W):
    """kron(band@Ah/3, band@Aw/3): (1024, H*W). Resize + count_include_pad pool."""
    band = _box_band_np(OUT_HW)
    mh = band @ _bilinear_matrix_np(OUT_HW, H) / 3.0
    mw = band @ _bilinear_matrix_np(OUT_HW, W) / 3.0
    return np.kron(mh, mw).astype(np.float32)


def yushuan_tail(f2_nhwc, f3_nhwc):
    N, H2, W2, C2 = f2_nhwc.shape
    _, H3, W3, C3 = f3_nhwc.shape
    Ctot = C2 + C3
    CPAD = _round_up(Ctot, 128)
    P = OUT_HW * OUT_HW

    HW2, HW3 = H2 * W2, H3 * W3
    HW2p, HW3p = _round_up(HW2, 8), _round_up(HW3, 8)

    # batch blocking: amortize per-step overhead, but keep >=2 grid steps so a
    # v7x parallel axis can use both TensorCores when N is small.
    b_blk = 1 if N <= 2 else min(8, (N + 1) // 2)
    Np = _round_up(N, b_blk)

    # channels-last slabs (N, H*W, C): a free reshape of the NHWC conv output
    f2r = jnp.pad(f2_nhwc.reshape(N, HW2, C2),
                  ((0, Np - N), (0, HW2p - HW2), (0, 0))).astype(jnp.bfloat16)
    f3r = jnp.pad(f3_nhwc.reshape(N, HW3, C3),
                  ((0, Np - N), (0, HW3p - HW3), (0, 0))).astype(jnp.bfloat16)

    m2 = jnp.asarray(np.pad(_fused_resize_pool_matrix(H2, W2),
                            ((0, 0), (0, HW2p - HW2))), jnp.bfloat16)
    m3 = jnp.asarray(np.pad(_fused_resize_pool_matrix(H3, W3),
                            ((0, 0), (0, HW3p - HW3))), jnp.bfloat16)

    out = pl.pallas_call(
        _tail_kernel,
        out_shape=jax.ShapeDtypeStruct((Np, 1, CPAD), jnp.float32),
        grid=(Np // b_blk,),
        in_specs=[
            pl.BlockSpec((b_blk, HW2p, C2), lambda n: (n, 0, 0)),
            pl.BlockSpec((P, HW2p), lambda n: (0, 0)),
            pl.BlockSpec((b_blk, HW3p, C3), lambda n: (n, 0, 0)),
            pl.BlockSpec((P, HW3p), lambda n: (0, 0)),
        ],
        out_specs=pl.BlockSpec((b_blk, 1, CPAD), lambda n: (n, 0, 0)),
        compiler_params=pltpu.CompilerParams(dimension_semantics=("parallel",)),
    )(f2r, m2, f3r, m3)
    return out.reshape(Np, CPAD)[:N, :Ctot]


# ----------------------------------------------------------------------------
# Forward pass
# ----------------------------------------------------------------------------
def yushuan_patch_forward(x_nchw, params):
    # stand-in backbone features (stride 8 and stride 16, like out_indices=(2,3))
    x_nhwc = jnp.transpose(x_nchw, (0, 2, 3, 1))
    f2 = conv3x3_relu(x_nhwc, params['w1'], params['b1'], stride=8)  # (N,H/8, W/8, C2)
    f3 = conv3x3_relu(f2, params['w2'], params['b2'], stride=2)      # (N,H/16,W/16,C3)
    return yushuan_tail(f2, f3)                                      # (N, C2+C3)


# Pure-JAX reference of the post-backbone pipeline (sanity check), NCHW inputs.
def reference_tail(f2, f3, ah2, aw2, ah3, aw3):
    def resize(f, Ah, Aw):
        return jnp.einsum('oh,nchw,xw->ncox', Ah, f, Aw)
    r = jnp.concatenate([resize(f2, ah2, aw2), resize(f3, ah3, aw3)], axis=1)
    rp = jnp.pad(r, ((0, 0), (0, 0), (1, 1), (1, 1)))
    pooled = sum(rp[:, :, i:i + OUT_HW, j:j + OUT_HW]
                 for i in range(3) for j in range(3)) / 9.0
    nrm = jnp.maximum(jnp.sqrt(jnp.sum(pooled ** 2, axis=1, keepdims=True)), 1e-12)
    return jnp.mean(pooled / nrm, axis=(2, 3))


if __name__ == "__main__":
    key = jax.random.PRNGKey(0)
    kx, k1, k2, k3, k4 = jax.random.split(key, 5)
    N, Cin, H, W = 2, 3, 64, 64
    C2, C3 = 16, 32
    x = jax.random.normal(kx, (N, Cin, H, W), jnp.float32)
    params = {
        'w1': jax.random.normal(k1, (Cin * 9, C2), jnp.float32) / math.sqrt(Cin * 9),
        'b1': 0.1 * jax.random.normal(k2, (1, C2), jnp.float32),
        'w2': jax.random.normal(k3, (C2 * 9, C3), jnp.float32) / math.sqrt(C2 * 9),
        'b2': 0.1 * jax.random.normal(k4, (1, C3), jnp.float32),
    }

    out = jax.block_until_ready(yushuan_patch_forward(x, params))
    assert out.shape == (N, C2 + C3) and out.dtype == jnp.float32

    # sanity-check the Pallas tail kernel against a pure-JAX reference
    x_nhwc = jnp.transpose(x, (0, 2, 3, 1))
    f2 = conv3x3_relu(x_nhwc, params['w1'], params['b1'], stride=8)
    f3 = conv3x3_relu(f2, params['w2'], params['b2'], stride=2)
    f2_nchw = jnp.transpose(f2, (0, 3, 1, 2))
    f3_nchw = jnp.transpose(f3, (0, 3, 1, 2))
    ah2 = jnp.asarray(_bilinear_matrix_np(OUT_HW, f2.shape[1]), jnp.float32)
    aw2 = jnp.asarray(_bilinear_matrix_np(OUT_HW, f2.shape[2]), jnp.float32)
    ah3 = jnp.asarray(_bilinear_matrix_np(OUT_HW, f3.shape[1]), jnp.float32)
    aw3 = jnp.asarray(_bilinear_matrix_np(OUT_HW, f3.shape[2]), jnp.float32)
    ref = reference_tail(f2_nchw, f3_nchw, ah2, aw2, ah3, aw3)
    np.testing.assert_allclose(np.asarray(out), np.asarray(ref),
                               rtol=3e-2, atol=3e-3)

    print("KERNEL_OK")
</pallas_src>

<mosaic_0001>
module attributes {stable_mosaic.version = 11 : i64} {
  func.func @_matmul_bias_relu_kernel(%arg0: i32, %arg1: i32, %arg2: i32, %arg3: memref<128x128xbf16, #tpu.memory_space<vmem>>, %arg4: memref<128x128xbf16, #tpu.memory_space<vmem>>, %arg5: memref<1x128xf32, #tpu.memory_space<vmem>>, %arg6: memref<128x128xf32, #tpu.memory_space<vmem>>, %arg7: memref<128x128xf32, #tpu.memory_space<vmem>>) attributes {dimension_semantics = [#tpu.dimension_semantics<parallel>, #tpu.dimension_semantics<parallel>, #tpu.dimension_semantics<arbitrary>], iteration_bounds = array<i64: 1, 1, 1>, scalar_prefetch = 0 : i64, scratch_operands = 1 : i64, tpu.core_type = #tpu.core_type<tc>, window_params = [{transform_indices = @transform_0, window_bounds = array<i64: 128, 128>}, {transform_indices = @transform_1, window_bounds = array<i64: 128, 128>}, {transform_indices = @transform_2, window_bounds = array<i64: 1, 128>}, {transform_indices = @transform_3, window_bounds = array<i64: 128, 128>}]} {
    %c0_i32 = arith.constant 0 : i32
    %0 = arith.cmpi eq, %arg2, %c0_i32 : i32
    %1 = arith.extui %0 : i1 to i32
    %c0_i32_0 = arith.constant 0 : i32
    %2 = arith.cmpi ne, %1, %c0_i32_0 : i32
    scf.if %2 {
      %cst_10 = arith.constant 0.000000e+00 : f32
      %12 = vector.broadcast %cst_10 : f32 to vector<128x128xf32>
      %c0_11 = arith.constant 0 : index
      %c0_12 = arith.constant 0 : index
      %13 = vector.load %arg7[%c0_11, %c0_12] : memref<128x128xf32, #tpu.memory_space<vmem>>, vector<128x128xf32>
      tpu.vector_store %arg7[%c0_11, %c0_12], %12 {strides = array<i32>} : memref<128x128xf32, #tpu.memory_space<vmem>>, vector<128x128xf32>,
    } else {
    }
    %c0 = arith.constant 0 : index
    %c0_1 = arith.constant 0 : index
    %3 = vector.load %arg7[%c0, %c0_1] : memref<128x128xf32, #tpu.memory_space<vmem>>, vector<128x128xf32>
    %c0_2 = arith.constant 0 : index
    %c0_3 = arith.constant 0 : index
    %4 = vector.load %arg3[%c0_2, %c0_3] : memref<128x128xbf16, #tpu.memory_space<vmem>>, vector<128x128xbf16>
    %c0_4 = arith.constant 0 : index
    %c0_5 = arith.constant 0 : index
    %5 = vector.load %arg4[%c0_4, %c0_5] : memref<128x128xbf16, #tpu.memory_space<vmem>>, vector<128x128xbf16>
    %cst = arith.constant dense<0.000000e+00> : vector<128x128xf32>
    %6 = tpu.matmul %4, %5, %cst {dimension_numbers = #tpu.dot_dimension_numbers<[1], [0], [0], [1], [0, 0, 1, 1], [], []>} : vector<128x128xbf16>, vector<128x128xbf16>, vector<128x128xf32> -> vector<128x128xf32>
    %7 = arith.addf %3, %6 : vector<128x128xf32>
    %c0_6 = arith.constant 0 : index
    %c0_7 = arith.constant 0 : index
    %8 = vector.load %arg7[%c0_6, %c0_7] : memref<128x128xf32, #tpu.memory_space<vmem>>, vector<128x128xf32>
    tpu.vector_store %arg7[%c0_6, %c0_7], %7 {strides = array<i32>} : memref<128x128xf32, #tpu.memory_space<vmem>>, vector<128x128xf32>,
    %c0_i32_8 = arith.constant 0 : i32
    %9 = arith.cmpi eq, %arg2, %c0_i32_8 : i32
    %10 = arith.extui %9 : i1 to i32
    %c0_i32_9 = arith.constant 0 : i32
    %11 = arith.cmpi ne, %10, %c0_i32_9 : i32
    scf.if %11 {
      %c0_10 = arith.constant 0 : index
      %c0_11 = arith.constant 0 : index
      %12 = vector.load %arg7[%c0_10, %c0_11] : memref<128x128xf32, #tpu.memory_space<vmem>>, vector<128x128xf32>
      %c0_12 = arith.constant 0 : index
      %c0_13 = arith.constant 0 : index
      %13 = vector.load %arg5[%c0_12, %c0_13] : memref<1x128xf32, #tpu.memory_space<vmem>>, vector<1x128xf32>
      %14 = vector.broadcast %13 : vector<1x128xf32> to vector<128x128xf32>
      %15 = arith.addf %12, %14 : vector<128x128xf32>
      %cst_14 = arith.constant 0.000000e+00 : f32
      %16 = vector.broadcast %cst_14 : f32 to vector<128x128xf32>
      %17 = arith.maximumf %15, %16 : vector<128x128xf32>
      %c0_15 = arith.constant 0 : index
      %c0_16 = arith.constant 0 : index
      %18 = vector.load %arg6[%c0_15, %c0_16] : memref<128x128xf32, #tpu.memory_space<vmem>>, vector<128x128xf32>
      tpu.vector_store %arg6[%c0_15, %c0_16], %17 {strides = array<i32>} : memref<128x128xf32, #tpu.memory_space<vmem>>, vector<128x128xf32>,
    } else {
    }
    return
  }
  func.func @transform_0(%arg0: i32, %arg1: i32, %arg2: i32) -> (i32, i32) {
    %c0_i32 = arith.constant 0 : i32
    return %arg0, %arg2 : i32, i32
  }
  func.func @transform_1(%arg0: i32, %arg1: i32, %arg2: i32) -> (i32, i32) {
    %c0_i32 = arith.constant 0 : i32
    return %arg2, %arg1 : i32, i32
  }
  func.func @transform_2(%arg0: i32, %arg1: i32, %arg2: i32) -> (i32, i32) {
    %c0_i32 = arith.constant 0 : i32
    %c0_i32_0 = arith.constant 0 : i32
    return %c0_i32, %arg1 : i32, i32
  }
  func.func @transform_3(%arg0: i32, %arg1: i32, %arg2: i32) -> (i32, i32) {
    %c0_i32 = arith.constant 0 : i32
    return %arg0, %arg1 : i32, i32
  }
}

</mosaic_0001>

<bundles_post_ra>
// kernel: tpu_custom_call.1
= control target key start
LH: loop header
LB: loop body
LE: loop exit
PB: predicated region body
PF: predicated region fallthrough
CT: control target
= control target key end

     0   :  { %8 = vsyncpa [#allocation4], 0  ;;  %s671_s0 = inlined_call_operand.hbm [shape: bf16[128,128], index: 0, kind: input, shape index: {}]   ;;  %s672_s1 = inlined_call_operand.hbm [shape: bf16[128,128], index: 1, kind: input, shape index: {}]   ;;  %s673_s2 = inlined_call_operand.vmem [shape: f32[1,128], index: 2, kind: input, shape index: {}]   ;;  %s674_s3 = inlined_call_operand.hbm [shape: f32[128,128], index: 3, kind: output, shape index: {}]  }
   0x1   :  { %9 = vsyncpa [#allocation7], 0 }
   0x2   :  { %10 = vsyncpa [#allocation5], 0  ;;  %s605_s12 = smov [#allocation3]   ;;  %s533_s16 = scalar_lea.hbm %s671_s0, 1024 }
   0x3   :  { %s16_s13 = sshll.u32 %s605_s12, 4  ;;  %p534_p0 = scmp.ne.s32.totalorder %s671_s0, %s533_s16  ;;  %s17_s13 = int_to_ptr.vmem [resolvable:$true] %s16_s13 }
   0x4   :  { %p537_p1 = scmp.lt.u32.totalorder %s533_s16, %s671_s0 }
   0x6   :  { %p539_p2 = pnand %p537_p1, %p534_p0 }
   0x8   :  { %542 = shalt.err (!%p539_p2)
}
   0x9   :  { %s543_s21 = scalar_lea.vmem %s17_s13, 1024  ;;  %p548_p4 = scmp.lt.s32.totalorder %s17_s13, %s17_s13 }
   0xa   :  { %p544_p3 = scmp.ne.s32.totalorder %s17_s13, %s543_s21  ;;  %p549_p5 = scmp.lt.s32.totalorder %s543_s21, %s543_s21 }
   0xc   :  { %p550_p6 = por %p549_p5, %p548_p4 }
   0xe   :  { %p551_p7 = pnand %p550_p6, %p544_p3 }
  0x10   :  { %554 = shalt.err (!%p551_p7)
}
  0x11   :  { %s606_s22 = smov 64   ;;  %s607_s23 = smov 4  }
  0x12   :  { %22 = dma.hbm_to_vmem [thread:$0]  %s671_s0, 1024, %s17_s13, [#allocation4], %s606_s22, %s606_s22, %s607_s23  }
  0x13   :  { %s608_s26 = smov [#allocation6]   ;;  %s555_s30 = scalar_lea.hbm %s672_s1, 1024 }
  0x14   :  { %s28_s27 = sshll.u32 %s608_s26, 4  ;;  %p556_p8 = scmp.ne.s32.totalorder %s672_s1, %s555_s30  ;;  %s29_s27 = int_to_ptr.vmem [resolvable:$true] %s28_s27 }
  0x15   :  { %p559_p9 = scmp.lt.u32.totalorder %s555_s30, %s672_s1 }
  0x17   :  { %p561_p10 = pnand %p559_p9, %p556_p8 }
  0x19   :  { %564 = shalt.err (!%p561_p10)
}
  0x1a   :  { %s565_s8 = scalar_lea.vmem %s29_s27, 1024  ;;  %p570_p12 = scmp.lt.s32.totalorder %s29_s27, %s29_s27 }
  0x1b   :  { %p566_p11 = scmp.ne.s32.totalorder %s29_s27, %s565_s8  ;;  %p571_p13 = scmp.lt.s32.totalorder %s565_s8, %s565_s8 }
  0x1d   :  { %p572_p0 = por %p571_p13, %p570_p12 }
  0x1f   :  { %p573_p1 = pnand %p572_p0, %p566_p11 }
  0x21   :  { %576 = shalt.err (!%p573_p1)
}
  0x22   :  { %34 = dma.hbm_to_vmem [thread:$0]  %s672_s1, 1024, %s29_s27, [#allocation7], %s606_s22, %s606_s22, %s607_s23  }
  0x23   :  { %599 = dma.done.wait [#allocation4], 1024  }
  0x24   :  { %600 = vsyncadd [#allocation4], 4294966272 }
  0x25   :  { %601 = dma.done.wait [#allocation7], 1024  }
  0x26   :  { %602 = vsyncadd [#allocation7], 4294966272  ;;  %v517_v0 = vld [vmem:[#allocation6] sm:$0xff]   ;;  %v518_v1 = vld [vmem:[#allocation6 + $0x8] sm:$0xff]  }
  0x27   :  { %462 = vmatprep.subr.bf16.mxu0 %v517_v0  ;;  %494 = vmatprep.subr.bf16.mxu1 %v517_v0  ;;  %v519_v2 = vld [vmem:[#allocation6 + $0x10] sm:$0xff]   ;;  %v520_v3 = vld [vmem:[#allocation6 + $0x18] sm:$0xff]   ;;  %v525_v4 = vld [vmem:[#allocation3] sm:$0xff]  }
  0x28   :  { %463 = vmatpush3.bf16.msra.mxu0 %v517_v0  ;;  %502 = vmatpush3.bf16.msra.mxu1 %v517_v0  ;;  %v526_v5 = vld [vmem:[#allocation3 + $0x20] sm:$0xff]   ;;  %v522_v7 = vld [vmem:[#allocation6 + $0x28] sm:$0xff]   ;;  %v523_v8 = vld [vmem:[#allocation6 + $0x30] sm:$0xff]  }
  0x29   :  { %464 = vmatprep.subr.bf16.mxu0 %v518_v1  ;;  %495 = vmatprep.subr.bf16.mxu1 %v518_v1  ;;  %v521_v6 = vld [vmem:[#allocation6 + $0x20] sm:$0xff]   ;;  %v524_v9 = vld [vmem:[#allocation6 + $0x38] sm:$0xff]   ;;  %v527_v10 = vld [vmem:[#allocation3 + $0x8] sm:$0xff]  }
  0x2a   :  { %478 = vmatprep.mubr.bf16.mxu0 %v525_v4  ;;  %486 = vmatprep.mubr.bf16.mxu1 %v526_v5  ;;  %v528_v11 = vld [vmem:[#allocation3 + $0x28] sm:$0xff]   ;;  %v529_v12 = vld [vmem:[#allocation3 + $0x10] sm:$0xff]   ;;  %v531_v14 = vld [vmem:[#allocation3 + $0x18] sm:$0xff]  }
  0x2b   :  { %v530_v13 = vld [vmem:[#allocation3 + $0x30] sm:$0xff]   ;;  %v532_v15 = vld [vmem:[#allocation3 + $0x38] sm:$0xff]   ;;  %v445_v16 = vld [vmem:[%s673_s2] ss:$0 sm:$0xff]  ;;  %s609_s2 = smov [#allocation8]  }
  0x2c   :  { %465 = vmatpush3.bf16.msra.mxu0 %v518_v1  ;;  %503 = vmatpush3.bf16.msra.mxu1 %v518_v1  ;;  %s416_s11 = sshll.u32 %s609_s2, 4  ;;  %s417_s11 = int_to_ptr.vmem [resolvable:$true] %s416_s11 }
  0x2d   :  { %466 = vmatprep.subr.bf16.mxu0 %v519_v2  ;;  %496 = vmatprep.subr.bf16.mxu1 %v519_v2  ;;  %s577_s12 = scalar_lea.vmem %s417_s11, 2048  ;;  %p582_p3 = scmp.lt.s32.totalorder %s417_s11, %s417_s11 }
  0x2e   :  { %p578_p2 = scmp.ne.s32.totalorder %s417_s11, %s577_s12  ;;  %p583_p4 = scmp.lt.s32.totalorder %s577_s12, %s577_s12 }
  0x30   :  { %467 = vmatpush3.bf16.msra.mxu0 %v519_v2  ;;  %504 = vmatpush3.bf16.msra.mxu1 %v519_v2  ;;  %p584_p5 = por %p583_p4, %p582_p3 }
  0x31   :  { %468 = vmatprep.subr.bf16.mxu0 %v520_v3  ;;  %497 = vmatprep.subr.bf16.mxu1 %v520_v3 }
  0x32   :  { %p585_p6 = pnand %p584_p5, %p578_p2 }
  0x34   :  { %469 = vmatpush3.bf16.msra.mxu0 %v520_v3  ;;  %505 = vmatpush3.bf16.msra.mxu1 %v520_v3 }
  0x35   :  { %470 = vmatprep.subr.bf16.mxu0 %v521_v6  ;;  %498 = vmatprep.subr.bf16.mxu1 %v521_v6 }
  0x38   :  { %471 = vmatpush3.bf16.msra.mxu0 %v521_v6  ;;  %506 = vmatpush3.bf16.msra.mxu1 %v521_v6 }
  0x39   :  { %472 = vmatprep.subr.bf16.mxu0 %v522_v7  ;;  %499 = vmatprep.subr.bf16.mxu1 %v522_v7 }
  0x3c   :  { %473 = vmatpush3.bf16.msra.mxu0 %v522_v7  ;;  %507 = vmatpush3.bf16.msra.mxu1 %v522_v7 }
  0x3d   :  { %474 = vmatprep.subr.bf16.mxu0 %v523_v8  ;;  %500 = vmatprep.subr.bf16.mxu1 %v523_v8 }
  0x40   :  { %475 = vmatpush3.bf16.msra.mxu0 %v523_v8  ;;  %508 = vmatpush3.bf16.msra.mxu1 %v523_v8 }
  0x41   :  { %476 = vmatprep.subr.bf16.mxu0 %v524_v9  ;;  %501 = vmatprep.subr.bf16.mxu1 %v524_v9 }
  0x44   :  { %477 = vmatpush3.bf16.msra.mxu0 %v524_v9  ;;  %509 = vmatpush3.bf16.msra.mxu1 %v524_v9 }
  0x47   :  { %479 = vmatmul.mubr.bf16.vlgmr.msra.gmra.mrb[0].mxu0 %v527_v10  ;;  %487 = vmatmul.mubr.bf16.vlgmr.msra.gmra.mrb[0].mxu1 %v528_v11 }
  0x48   :  { %482 = vmatprep.mubr.bf16.mxu0 %v529_v12  ;;  %490 = vmatprep.mubr.bf16.mxu1 %v530_v13 }
  0x4f   :  { %483 = vmatmul.mubr.bf16.gmra.mrb[4].mxu0 %v531_v14  ;;  %491 = vmatmul.mubr.bf16.gmra.mrb[4].mxu1 %v532_v15 }
 0x11a   :  { %v480_v17 = vpop.f32.mrb[0].mxu0  ;;  %v488_v18 = vpop.f32.mrb[0].mxu1 }
 0x11b   :  { %v365_v19 = vadd.f32 %v480_v17, %v445_v16  ;;  %v373_v20 = vadd.f32 %v488_v18, %v445_v16  ;;  %v242_v21 = vpop.f32.mrb[1].mxu0  ;;  %v274_v22 = vpop.f32.mrb[1].mxu1 }
 0x11c   :  { %v363_v23 = vadd.f32 %v445_v16, %v242_v21  ;;  %v371_v24 = vadd.f32 %v445_v16, %v274_v22  ;;  %v481_v25 = vpop.f32.mrb[2].mxu0  ;;  %v489_v26 = vpop.f32.mrb[2].mxu1 }
 0x11d   :  { %v381_v27 = vmax.f32 %v365_v19, 0.0  ;;  %v389_v28 = vmax.f32 %v373_v20, 0.0  ;;  %v366_v29 = vadd.f32 %v481_v25, %v445_v16  ;;  %v374_v30 = vadd.f32 %v489_v26, %v445_v16  ;;  %v245_v31 = vpop.f32.mrb[3].mxu0  ;;  %v277_v32 = vpop.f32.mrb[3].mxu1 }
 0x11e   :  { %v379_v33 = vmax.f32 %v363_v23, 0.0  ;;  %v387_v34 = vmax.f32 %v371_v24, 0.0  ;;  %v364_v35 = vadd.f32 %v445_v16, %v245_v31  ;;  %v372_v36 = vadd.f32 %v445_v16, %v277_v32 }
 0x11f   :  { %397 = vst [vmem:[#allocation8 + $0x10] sm:$0xff] %v381_v27  ;;  %405 = vst [vmem:[#allocation8 + $0x50] sm:$0xff] %v389_v28  ;;  %v382_v37 = vmax.f32 %v366_v29, 0.0  ;;  %v390_v38 = vmax.f32 %v374_v30, 0.0 }
 0x120   :  { %395 = vst [vmem:[#allocation8] sm:$0xff] %v379_v33  ;;  %403 = vst [vmem:[#allocation8 + $0x40] sm:$0xff] %v387_v34  ;;  %v380_v39 = vmax.f32 %v364_v35, 0.0  ;;  %v388_v40 = vmax.f32 %v372_v36, 0.0 }
 0x121   :  { %398 = vst [vmem:[#allocation8 + $0x18] sm:$0xff] %v382_v37  ;;  %406 = vst [vmem:[#allocation8 + $0x58] sm:$0xff] %v390_v38 }
 0x122   :  { %396 = vst [vmem:[#allocation8 + $0x8] sm:$0xff] %v380_v39  ;;  %404 = vst [vmem:[#allocation8 + $0x48] sm:$0xff] %v388_v40  ;;  %v484_v41 = vpop.f32.mrb[4].mxu0  ;;  %v492_v42 = vpop.f32.mrb[4].mxu1 }
 0x123   :  { %v369_v43 = vadd.f32 %v484_v41, %v445_v16  ;;  %v377_v44 = vadd.f32 %v492_v42, %v445_v16  ;;  %v258_v45 = vpop.f32.mrb[5].mxu0  ;;  %v290_v46 = vpop.f32.mrb[5].mxu1 }
 0x124   :  { %v367_v47 = vadd.f32 %v445_v16, %v258_v45  ;;  %v375_v48 = vadd.f32 %v445_v16, %v290_v46  ;;  %v485_v49 = vpop.f32.mrb[6].mxu0  ;;  %v493_v50 = vpop.f32.mrb[6].mxu1 }
 0x125   :  { %v385_v51 = vmax.f32 %v369_v43, 0.0  ;;  %v393_v52 = vmax.f32 %v377_v44, 0.0  ;;  %v370_v53 = vadd.f32 %v485_v49, %v445_v16  ;;  %v378_v54 = vadd.f32 %v493_v50, %v445_v16  ;;  %v261_v55 = vpop.f32.mrb[7].mxu0  ;;  %v293_v56 = vpop.f32.mrb[7].mxu1 }
 0x126   :  { %v383_v57 = vmax.f32 %v367_v47, 0.0  ;;  %v391_v58 = vmax.f32 %v375_v48, 0.0  ;;  %v368_v59 = vadd.f32 %v445_v16, %v261_v55  ;;  %v376_v60 = vadd.f32 %v445_v16, %v293_v56 }
 0x127   :  { %401 = vst [vmem:[#allocation8 + $0x30] sm:$0xff] %v385_v51  ;;  %409 = vst [vmem:[#allocation8 + $0x70] sm:$0xff] %v393_v52  ;;  %v386_v61 = vmax.f32 %v370_v53, 0.0  ;;  %v394_v62 = vmax.f32 %v378_v54, 0.0 }
 0x128   :  { %399 = vst [vmem:[#allocation8 + $0x20] sm:$0xff] %v383_v57  ;;  %407 = vst [vmem:[#allocation8 + $0x60] sm:$0xff] %v391_v58  ;;  %v384_v63 = vmax.f32 %v368_v59, 0.0  ;;  %v392_v0 = vmax.f32 %v376_v60, 0.0 }
 0x129   :  { %402 = vst [vmem:[#allocation8 + $0x38] sm:$0xff] %v386_v61  ;;  %410 = vst [vmem:[#allocation8 + $0x78] sm:$0xff] %v394_v62 }
 0x12a   :  { %400 = vst [vmem:[#allocation8 + $0x28] sm:$0xff] %v384_v63  ;;  %408 = vst [vmem:[#allocation8 + $0x68] sm:$0xff] %v392_v0 }
 0x12b   :  { %588 = shalt.err (!%p585_p6)
}
 0x12c   :  { %s589_s15 = scalar_lea.hbm %s674_s3, 2048 }
 0x12d   :  { %p590_p7 = scmp.ne.s32.totalorder %s674_s3, %s589_s15  ;;  %p593_p8 = scmp.lt.u32.totalorder %s589_s15, %s674_s3 }
 0x12f   :  { %p595_p9 = pnand %p593_p8, %p590_p7 }
 0x131   :  { %598 = shalt.err (!%p595_p9)
}
 0x132   :  { %s610_s20 = smov 128   ;;  %s611_s21 = smov 8  }
 0x133   :  { %422 = dma.vmem_to_hbm [thread:$0]  %s417_s11, 2048, %s674_s3, [#allocation5], %s610_s20, %s610_s20, %s611_s21  }
 0x134   :  { %603 = dma.done.wait [#allocation5], 2048  }
 0x135   :  { %604 = vsyncadd [#allocation5], 4294965248 }
 0x136   :  { %426 = vsyncpa [#allocation4], 1 }
 0x137   :  { %427 = vsyncpa [#allocation7], 1 }
 0x138   :  { %428 = vsyncpa [#allocation5], 1 }

</bundles_post_ra>
